<compile_context>
chip_gen: v7x
topology: tpu7x:2x2x1
jax: 0.10.0
libtpu: 0.0.40
codegen_flags: <defaults>
</compile_context>

<pallas_src>
import jax
import jax.numpy as jnp
from jax.experimental import pallas as pl
from jax.experimental.pallas import tpu as pltpu


def identity_gamma_kernel(x_ref, o_ref):
    # Single (1, 128) tile: one vld + one vst. No grid, no scratch, no
    # pipelining — any of those would be pure overhead at 512 B.
    o_ref[...] = x_ref[...]


def identity_gamma(x):
    """IdentityGamma.forward: x is (1, 128); returns x[0] with shape (128,)."""
    assert x.shape == (1, 128), f"IdentityGamma expects (1, 128), got {x.shape}"
    out2d = pl.pallas_call(
        identity_gamma_kernel,
        out_shape=jax.ShapeDtypeStruct((1, 128), x.dtype),
        # Full-array blocks in VMEM, no grid: one DMA in, one DMA out.
        in_specs=[pl.BlockSpec(memory_space=pltpu.VMEM)],
        out_specs=pl.BlockSpec(memory_space=pltpu.VMEM),
    )(x)
    # (1, 128) -> (128,) is a free metadata squeeze outside the kernel.
    return jnp.squeeze(out2d, axis=0)


if __name__ == "__main__":
    key = jax.random.PRNGKey(0)
    # Module contract: input is (1, 128)
    x = jax.random.normal(key, (1, 128), dtype=jnp.float32)

    out = identity_gamma(x)
    out = jax.block_until_ready(out)

    # Verify semantics against the reference (x[0]).
    expected = x[0]
    assert out.shape == (128,), out.shape
    assert out.dtype == x.dtype, out.dtype
    assert jnp.allclose(out, expected), "mismatch vs x[0]"

    print("KERNEL_OK")
</pallas_src>

<mosaic_0001>
module attributes {stable_mosaic.version = 11 : i64} {
  func.func @identity_gamma_kernel(%arg0: memref<1x128xf32, #tpu.memory_space<vmem>>, %arg1: memref<1x128xf32, #tpu.memory_space<vmem>>) attributes {dimension_semantics = [], scalar_prefetch = 0 : i64, scratch_operands = 0 : i64, tpu.core_type = #tpu.core_type<tc>} {
    %c0 = arith.constant 0 : index
    %c0_0 = arith.constant 0 : index
    %0 = vector.load %arg0[%c0, %c0_0] : memref<1x128xf32, #tpu.memory_space<vmem>>, vector<1x128xf32>
    %c0_1 = arith.constant 0 : index
    %c0_2 = arith.constant 0 : index
    %1 = vector.load %arg1[%c0_1, %c0_2] : memref<1x128xf32, #tpu.memory_space<vmem>>, vector<1x128xf32>
    tpu.vector_store %arg1[%c0_1, %c0_2], %0 {strides = array<i32>} : memref<1x128xf32, #tpu.memory_space<vmem>>, vector<1x128xf32>,
    return
  }
}

</mosaic_0001>

<bundles_post_ra>
// kernel: tpu_custom_call.1
= control target key start
LH: loop header
LB: loop body
LE: loop exit
PB: predicated region body
PF: predicated region fallthrough
CT: control target
= control target key end

     0   :  { %6 = vsyncpa [#allocation3], 0  ;;  %s124_s0 = inlined_call_operand.hbm [shape: f32[1,128], index: 0, kind: input, shape index: {}]   ;;  %s125_s1 = inlined_call_operand.hbm [shape: f32[1,128], index: 1, kind: output, shape index: {}]  }
   0x1   :  { %7 = vsyncpa [#allocation4], 0  ;;  %s88_s6 = smov [#allocation2]   ;;  %s40_s10 = scalar_lea.hbm %s124_s0, 16 }
   0x2   :  { %s14_s7 = sshll.u32 %s88_s6, 4  ;;  %p41_p0 = scmp.ne.s32.totalorder %s124_s0, %s40_s10  ;;  %s15_s7 = int_to_ptr.vmem [resolvable:$true] %s14_s7 }
   0x3   :  { %p44_p1 = scmp.lt.u32.totalorder %s40_s10, %s124_s0 }
   0x5   :  { %p46_p2 = pnand %p44_p1, %p41_p0 }
   0x7   :  { %49 = shalt.err (!%p46_p2)
}
   0x8   :  { %s50_s15 = scalar_lea.vmem %s15_s7, 16  ;;  %s54_s16 = scalar_lea.vmem %s15_s7, 32 }
   0x9   :  { %p51_p3 = scmp.ne.s32.totalorder %s15_s7, %s50_s15  ;;  %p55_p4 = scmp.lt.s32.totalorder %s15_s7, %s15_s7 }
   0xa   :  { %p56_p5 = scmp.lt.s32.totalorder %s54_s16, %s50_s15 }
   0xc   :  { %p57_p6 = por %p56_p5, %p55_p4 }
   0xe   :  { %p58_p7 = pnand %p57_p6, %p51_p3 }
  0x10   :  { %61 = shalt.err (!%p58_p7)
}
  0x11   :  { %17 = dma.hbm_to_vmem [thread:$0]  %s124_s0, 16, %s15_s7, [#allocation3]  }
  0x12   :  { %84 = dma.done.wait [#allocation3], 16  }
  0x13   :  { %85 = vsyncadd [#allocation3], 4294967280  ;;  %s89_s19 = smov [#allocation5]   ;;  %v21_v0 = vld [vmem:[#allocation2] sm:$0x1] }
  0x14   :  { %s29_s20 = sshll.u32 %s89_s19, 4  ;;  %22 = vst [vmem:[#allocation5] sm:$0x1] %v21_v0  ;;  %s30_s20 = int_to_ptr.vmem [resolvable:$true] %s29_s20 }
  0x15   :  { %s62_s21 = scalar_lea.vmem %s30_s20, 16  ;;  %s66_s22 = scalar_lea.vmem %s30_s20, 32 }
  0x16   :  { %p63_p8 = scmp.ne.s32.totalorder %s30_s20, %s62_s21  ;;  %p67_p9 = scmp.lt.s32.totalorder %s30_s20, %s30_s20 }
  0x17   :  { %p68_p10 = scmp.lt.s32.totalorder %s66_s22, %s62_s21 }
  0x19   :  { %p69_p11 = por %p68_p10, %p67_p9 }
  0x1b   :  { %p70_p12 = pnand %p69_p11, %p63_p8 }
  0x1d   :  { %73 = shalt.err (!%p70_p12)
}
  0x1e   :  { %s74_s25 = scalar_lea.hbm %s125_s1, 16 }
  0x1f   :  { %p75_p13 = scmp.ne.s32.totalorder %s125_s1, %s74_s25  ;;  %p78_p0 = scmp.lt.u32.totalorder %s74_s25, %s125_s1 }
  0x21   :  { %p80_p1 = pnand %p78_p0, %p75_p13 }
  0x23   :  { %83 = shalt.err (!%p80_p1)
}
  0x24   :  { %32 = dma.vmem_to_hbm [thread:$0]  %s30_s20, 16, %s125_s1, [#allocation4]  }
  0x25   :  { %86 = dma.done.wait [#allocation4], 16  }
  0x26   :  { %87 = vsyncadd [#allocation4], 4294967280 }
  0x27   :  { %36 = vsyncpa [#allocation3], 1 }
  0x28   :  { %37 = vsyncpa [#allocation4], 1 }

</bundles_post_ra>
